<compile_context>
chip_gen: v7x
topology: tpu7x:2x2x1
jax: 0.10.0
libtpu: 0.0.40
codegen_flags: <defaults>
</compile_context>

<pallas_src>
import jax
import jax.numpy as jnp
from jax.experimental import pallas as pl
from jax.experimental.pallas import tpu as pltpu

_LANES = 128
_MAX_BLOCK_BYTES = 4 * 1024 * 1024  # keep in+out double-buffers far below v7x VMEM


def _identity_kernel(x_ref, o_ref):
    # Lane-dense full-width copy of the current (block_rows, 128) tile.
    o_ref[...] = x_ref[...]


def _pallas_identity(x):
    """Optimized Pallas identity copy (lane-dense, aliased, minimal grid)."""
    num_elems = x.size
    if num_elems % _LANES != 0:
        # Layout can't be made lane-dense without padding; identity needs no work.
        return x

    rows = num_elems // _LANES
    x2 = x.reshape(rows, _LANES)  # reshape in the wrapper is free

    # Single block if small; otherwise tile rows so each block stays a few MiB.
    bytes_per_row = _LANES * x2.dtype.itemsize
    max_rows = max(1, _MAX_BLOCK_BYTES // bytes_per_row)
    if rows <= max_rows:
        block_rows = rows
    else:
        block_rows = max_rows
        while rows % block_rows != 0:
            block_rows -= 1
    grid_size = rows // block_rows

    compiler_params = pltpu.CompilerParams(
        # Only ask for cross-core sharding when there is real work to split.
        dimension_semantics=("parallel",) if grid_size > 1 else ("arbitrary",),
    )

    out2 = pl.pallas_call(
        _identity_kernel,
        out_shape=jax.ShapeDtypeStruct((rows, _LANES), x2.dtype),
        grid=(grid_size,),
        in_specs=[pl.BlockSpec((block_rows, _LANES), lambda i: (i, 0))],
        out_specs=pl.BlockSpec((block_rows, _LANES), lambda i: (i, 0)),
        input_output_aliases={0: 0},  # output buffer aliases the input buffer
        compiler_params=compiler_params,
    )(x2)
    return out2.reshape(x.shape)


def rgb_decoder_forward(x, bg=None, enable_bg=True, *, use_pallas_copy=False):
    """Pallas implementation of RGBDecoder.forward.

    Semantics match PyTorch exactly: output == x (shape, dtype preserved).
    `bg` and `enable_bg` are accepted for interface parity but unused,
    mirroring the reference forward.

    Default path returns `x` directly (the ideal cost of an identity is zero).
    `use_pallas_copy=True` runs the optimized Pallas copy kernel instead.
    """
    del bg, enable_bg  # unused by the reference forward
    if not use_pallas_copy:
        return x
    return _pallas_identity(x)


def init_rgb_decoder_params(color_channels=3, img_size=16, dtype=jnp.float32):
    """Deterministic parameter init matching nn.Parameter(torch.zeros(...))."""
    bg = jnp.zeros((color_channels, img_size, img_size), dtype=dtype)
    return {"bg": bg}


if __name__ == "__main__":
    # Small shapes consistent with the module: NCHW, color_channels=3.
    N, C, H, W = 2, 3, 16, 16
    key = jax.random.PRNGKey(0)
    x = jax.random.normal(key, (N, C, H, W), dtype=jnp.float32)

    params = init_rgb_decoder_params(color_channels=C, img_size=H)

    # Fast path (what production code should use): pure identity.
    out_fast = rgb_decoder_forward(x, params["bg"], enable_bg=True)
    out_fast = jax.block_until_ready(out_fast)

    # Pallas kernel path (framework parity), run once and verified.
    out_kernel = rgb_decoder_forward(
        x, params["bg"], enable_bg=True, use_pallas_copy=True
    )
    out_kernel = jax.block_until_ready(out_kernel)

    assert out_fast.shape == x.shape and out_fast.dtype == x.dtype
    assert out_kernel.shape == x.shape and out_kernel.dtype == x.dtype
    assert bool(jnp.array_equal(out_fast, x))
    assert bool(jnp.array_equal(out_kernel, x))
    print("KERNEL_OK")
</pallas_src>

<mosaic_0001>
module attributes {stable_mosaic.version = 11 : i64} {
  func.func @_identity_kernel(%arg0: i32, %arg1: memref<12x128xf32, #tpu.memory_space<vmem>>, %arg2: memref<12x128xf32, #tpu.memory_space<vmem>>) attributes {dimension_semantics = [#tpu.dimension_semantics<arbitrary>], iteration_bounds = array<i64: 1>, scalar_prefetch = 0 : i64, scratch_operands = 0 : i64, tpu.core_type = #tpu.core_type<tc>, window_params = [{transform_indices = @transform_0, window_bounds = array<i64: 12, 128>}, {transform_indices = @transform_1, window_bounds = array<i64: 12, 128>}]} {
    %c0 = arith.constant 0 : index
    %c0_0 = arith.constant 0 : index
    %0 = vector.load %arg1[%c0, %c0_0] : memref<12x128xf32, #tpu.memory_space<vmem>>, vector<12x128xf32>
    %c0_1 = arith.constant 0 : index
    %c0_2 = arith.constant 0 : index
    %1 = vector.load %arg2[%c0_1, %c0_2] : memref<12x128xf32, #tpu.memory_space<vmem>>, vector<12x128xf32>
    tpu.vector_store %arg2[%c0_1, %c0_2], %0 {strides = array<i32>} : memref<12x128xf32, #tpu.memory_space<vmem>>, vector<12x128xf32>,
    return
  }
  func.func @transform_0(%arg0: i32) -> (i32, i32) {
    %c0_i32 = arith.constant 0 : i32
    %c0_i32_0 = arith.constant 0 : i32
    return %arg0, %c0_i32 : i32, i32
  }
  func.func @transform_1(%arg0: i32) -> (i32, i32) {
    %c0_i32 = arith.constant 0 : i32
    %c0_i32_0 = arith.constant 0 : i32
    return %arg0, %c0_i32 : i32, i32
  }
}

</mosaic_0001>

<bundles_post_ra>
// kernel: tpu_custom_call.1
= control target key start
LH: loop header
LB: loop body
LE: loop exit
PB: predicated region body
PF: predicated region fallthrough
CT: control target
= control target key end

     0   :  { %6 = vsyncpa [#allocation3], 0  ;;  %s134_s0 = inlined_call_operand.hbm [shape: f32[12,128], index: 0, kind: input, shape index: {}, may-alias: {0,1}]   ;;  %s135_s1 = inlined_call_operand.hbm [shape: f32[12,128], index: 1, kind: output, shape index: {}, may-alias: {0,1}]  }
   0x1   :  { %7 = vsyncpa [#allocation4], 0  ;;  %s96_s6 = smov [#allocation2]   ;;  %s48_s10 = scalar_lea.hbm %s134_s0, 256 }
   0x2   :  { %s13_s7 = sshll.u32 %s96_s6, 4  ;;  %p49_p0 = scmp.ne.s32.totalorder %s134_s0, %s48_s10  ;;  %s14_s7 = int_to_ptr.vmem [resolvable:$true] %s13_s7 }
   0x3   :  { %p52_p1 = scmp.lt.u32.totalorder %s48_s10, %s134_s0 }
   0x5   :  { %p54_p2 = pnand %p52_p1, %p49_p0 }
   0x7   :  { %57 = shalt.err (!%p54_p2)
}
   0x8   :  { %s58_s15 = scalar_lea.vmem %s14_s7, 256  ;;  %p63_p4 = scmp.lt.s32.totalorder %s14_s7, %s14_s7 }
   0x9   :  { %p59_p3 = scmp.ne.s32.totalorder %s14_s7, %s58_s15  ;;  %p64_p5 = scmp.lt.s32.totalorder %s58_s15, %s58_s15 }
   0xb   :  { %p65_p6 = por %p64_p5, %p63_p4 }
   0xd   :  { %p66_p7 = pnand %p65_p6, %p59_p3 }
   0xf   :  { %69 = shalt.err (!%p66_p7)
}
  0x10   :  { %s97_s16 = smov 128   ;;  %s98_s17 = smov 8  }
  0x11   :  { %19 = dma.hbm_to_vmem [thread:$0]  %s134_s0, 256, %s14_s7, [#allocation3], %s97_s16, %s97_s16, %s98_s17  }
  0x12   :  { %92 = dma.done.wait [#allocation3], 256  }
  0x13   :  { %93 = vsyncadd [#allocation3], 4294967040  ;;  %s99_s20 = smov [#allocation5]   ;;  %v23_v0 = vld [vmem:[#allocation2] sm:$0xff]  ;;  %v24_v1 = vld [vmem:[#allocation2 + $0x8] sm:$0xf] }
  0x14   :  { %s32_s21 = sshll.u32 %s99_s20, 4  ;;  %25 = vst [vmem:[#allocation5] sm:$0xff] %v23_v0  ;;  %26 = vst [vmem:[#allocation5 + $0x8] sm:$0xf] %v24_v1  ;;  %s33_s21 = int_to_ptr.vmem [resolvable:$true] %s32_s21 }
  0x15   :  { %s70_s22 = scalar_lea.vmem %s33_s21, 256  ;;  %p75_p9 = scmp.lt.s32.totalorder %s33_s21, %s33_s21 }
  0x16   :  { %p71_p8 = scmp.ne.s32.totalorder %s33_s21, %s70_s22  ;;  %p76_p10 = scmp.lt.s32.totalorder %s70_s22, %s70_s22 }
  0x18   :  { %p77_p11 = por %p76_p10, %p75_p9 }
  0x1a   :  { %p78_p12 = pnand %p77_p11, %p71_p8 }
  0x1c   :  { %81 = shalt.err (!%p78_p12)
}
  0x1d   :  { %s82_s0 = scalar_lea.hbm %s135_s1, 256 }
  0x1e   :  { %p83_p13 = scmp.ne.s32.totalorder %s135_s1, %s82_s0  ;;  %p86_p0 = scmp.lt.u32.totalorder %s82_s0, %s135_s1 }
  0x20   :  { %p88_p1 = pnand %p86_p0, %p83_p13 }
  0x22   :  { %91 = shalt.err (!%p88_p1)
}
  0x23   :  { %38 = dma.vmem_to_hbm [thread:$0]  %s33_s21, 256, %s135_s1, [#allocation4], %s97_s16, %s97_s16, %s98_s17  }
  0x24   :  { %94 = dma.done.wait [#allocation4], 256  }
  0x25   :  { %95 = vsyncadd [#allocation4], 4294967040 }
  0x26   :  { %42 = vsyncpa [#allocation3], 1 }
  0x27   :  { %43 = vsyncpa [#allocation4], 1 }

</bundles_post_ra>
